<compile_context>
chip_gen: v7x
topology: tpu7x:2x2x1
jax: 0.10.0
libtpu: 0.0.40
codegen_flags: <defaults>
</compile_context>

<pallas_src>
import numpy as np

import jax
import jax.numpy as jnp
from jax.experimental import pallas as pl
from jax.experimental.pallas import tpu as pltpu

_LANE = 128
_SUBLANE = 8
_MAX_BLOCK_ROWS = 2048        # 2 inputs x 2 buffers x TR*512B <= 4 MiB VMEM
_STEP_OVERHEAD_ROWS = 512     # ~0.35us fixed grid-step cost expressed in stream rows
_WEIGHTS = (8.0 / 15.0, 4.0 / 15.0, 2.0 / 15.0, 1.0 / 15.0)


# ----------------------------- Pallas kernel --------------------------------

def _fused_dice_ce_kernel(meta_ref, pred_ref, tgt_ref, out_ref, acc_ref):
    """One (TR,128) row-block: accumulate the 4 DiceCE reductions of its scale.

    meta_ref : SMEM int32 (3, nblocks): [scale id, last-block-of-scale, #valid elems]
    pred/tgt : VMEM (TR, 128) tiles of the concatenated multi-scale buffers
    out_ref  : SMEM f32 (n_scales, 4): [sum bce, sum sig*y, sum sig^2, sum y^2]
    acc_ref  : VMEM f32 (4, 8, 128) lane-parallel running partials of current scale
    """
    i = pl.program_id(0)
    tr = pred_ref.shape[0]
    block_elems = tr * _LANE

    @pl.when(i == 0)
    def _init():
        acc_ref[...] = jnp.zeros_like(acc_ref)

    x = pred_ref[...].astype(jnp.float32)
    y = tgt_ref[...].astype(jnp.float32)

    # sigmoid once; reuse for the stable BCE-with-logits term:
    #   bce = max(x,0) - x*y + softplus(-|x|),  softplus(-|x|) = -log(sigmoid(|x|))
    sig = jax.nn.sigmoid(x)
    sig_abs = jnp.where(x >= 0.0, sig, 1.0 - sig)
    bce = jnp.maximum(x, 0.0) - x * y - jnp.log(sig_abs)
    sig_sq = sig * sig

    def fold(t):  # (TR,128) -> (8,128) partials: pure VPU adds, no cross-lane work
        return jnp.sum(t.reshape(tr // _SUBLANE, _SUBLANE, _LANE), axis=0)

    # Target padding is exactly zero => sig*y and y*y never need a mask.
    acc_ref[1] += fold(sig * y)
    acc_ref[3] += fold(y * y)

    nvalid = meta_ref[2, i]

    @pl.when(nvalid >= block_elems)        # full block: no masking work at all
    def _full():
        acc_ref[0] += fold(bce)
        acc_ref[2] += fold(sig_sq)

    @pl.when(nvalid < block_elems)         # ragged tail block of a scale: iota mask
    def _tail():
        ridx = jax.lax.broadcasted_iota(jnp.int32, (tr, _LANE), 0)
        cidx = jax.lax.broadcasted_iota(jnp.int32, (tr, _LANE), 1)
        mask = ((ridx * _LANE + cidx) < nvalid).astype(jnp.float32)
        acc_ref[0] += fold(bce * mask)
        acc_ref[2] += fold(sig_sq * mask)

    @pl.when(meta_ref[1, i] == 1)          # last block of this scale: collapse + emit
    def _finalize():
        s = meta_ref[0, i]
        for k in range(4):
            out_ref[s, k] = jnp.sum(acc_ref[k])
        acc_ref[...] = jnp.zeros_like(acc_ref)


def _fused_dice_ce_sums(meta, pred_packed, tgt_packed, tr, n_scales):
    nblocks = pred_packed.shape[0] // tr
    return pl.pallas_call(
        _fused_dice_ce_kernel,
        out_shape=jax.ShapeDtypeStruct((n_scales, 4), jnp.float32),
        grid_spec=pltpu.PrefetchScalarGridSpec(
            num_scalar_prefetch=1,
            grid=(nblocks,),
            in_specs=[
                pl.BlockSpec((tr, _LANE), lambda i, meta: (i, 0)),
                pl.BlockSpec((tr, _LANE), lambda i, meta: (i, 0)),
            ],
            out_specs=pl.BlockSpec((n_scales, 4), lambda i, meta: (0, 0),
                                   memory_space=pltpu.MemorySpace.SMEM),
            scratch_shapes=[pltpu.VMEM((4, _SUBLANE, _LANE), jnp.float32)],
        ),
        compiler_params=pltpu.CompilerParams(
            # accumulator carried across row-blocks -> reduction axis
            dimension_semantics=("arbitrary",),
        ),
    )(meta, pred_packed, tgt_packed)


# ------------------------------- host-side glue ------------------------------

def _round_up(a, b):
    return -(-a // b) * b


def _row_alignment(dtypes):
    align = _SUBLANE
    for dt in dtypes:
        packing = max(1, 4 // np.dtype(dt).itemsize)   # bf16 packs 2 rows / sublane
        align = max(align, _SUBLANE * packing)
    return align


def _choose_block_rows(rows_per_scale, row_align):
    cands = [c for c in (8, 16, 32, 64, 128, 256, 512, 1024, _MAX_BLOCK_ROWS)
             if c % row_align == 0]
    best_tr, best_cost = cands[0], None
    for tr in cands:
        padded_rows = sum(_round_up(r, tr) for r in rows_per_scale)
        nblocks = sum(-(-r // tr) for r in rows_per_scale)
        cost = padded_rows + _STEP_OVERHEAD_ROWS * nblocks
        if best_cost is None or cost < best_cost:
            best_tr, best_cost = tr, cost
    return best_tr


def _build_schedule(elem_counts, row_align):
    rows = [-(-n // _LANE) for n in elem_counts]
    tr = _choose_block_rows(rows, row_align)
    scale_id, last_flag, nvalid = [], [], []
    for s, n in enumerate(elem_counts):
        nb = -(-rows[s] // tr)
        for j in range(nb):
            scale_id.append(s)
            last_flag.append(1 if j == nb - 1 else 0)
            nvalid.append(min(tr * _LANE, n - j * tr * _LANE))
    meta = np.stack([scale_id, last_flag, nvalid]).astype(np.int32)   # (3, nblocks)
    return tr, meta


def _pack_scales(arrays, tr):
    """Flatten each scale, zero-pad to whole (tr,128) blocks, concatenate row-wise."""
    # TODO(synk): this pad+concat is one extra XLA copy of pred/target; avoiding it
    # entirely would require manual ragged DMAs from 4 separate HBM refs.
    parts = []
    for a in arrays:
        flat = a.reshape(-1)
        rows_padded = _round_up(-(-flat.shape[0] // _LANE), tr)
        flat = jnp.pad(flat, (0, rows_padded * _LANE - flat.shape[0]))
        parts.append(flat.reshape(rows_padded, _LANE))
    return jnp.concatenate(parts, axis=0)


def _nearest_downsample_nchw(target, out_hw):
    """F.interpolate(target, size=out_hw, mode='nearest') for NCHW tensors."""
    H, W = target.shape[2], target.shape[3]
    h, w = int(out_hw[0]), int(out_hw[1])
    if h == H and w == W:
        return target
    if H % h == 0 and W % w == 0:            # 2x pyramid: cheap strided slice
        return target[:, :, :: H // h, :: W // w]
    idx_h = (jnp.arange(h) * H) // h         # integer-exact nearest indices
    idx_w = (jnp.arange(w) * W) // w
    return target[:, :, idx_h, :][:, :, :, idx_w]


def multi_scale_deep_supervision(preds, target):
    """MultiScaleDeepSupervision.forward with weights (1/15)*(8,4,2,1)."""
    n_scales = len(preds)
    tgts = [_nearest_downsample_nchw(target, p.shape[2:]) for p in preds]

    elem_counts = [int(np.prod(p.shape)) for p in preds]
    row_align = _row_alignment([p.dtype for p in preds] + [t.dtype for t in tgts])
    tr, meta = _build_schedule(elem_counts, row_align)

    pred_packed = _pack_scales(preds, tr)
    tgt_packed = _pack_scales(tgts, tr)

    sums = _fused_dice_ce_sums(jnp.asarray(meta), pred_packed, tgt_packed, tr, n_scales)

    n_vec = jnp.asarray(elem_counts, jnp.float32)
    ce = sums[:, 0] / n_vec
    dice = (2.0 * sums[:, 1]) / (sums[:, 2] + sums[:, 3] + 1e-06)
    losses = ce + (1.0 - dice)
    weights = jnp.asarray(_WEIGHTS[:n_scales], jnp.float32)
    return jnp.sum(weights * losses)


# --------------------------- pure-JAX reference -------------------------------

def _dice_ce_ref(pred, tgt):
    x = pred.astype(jnp.float32)
    y = tgt.astype(jnp.float32)
    bce = jnp.mean(jnp.maximum(x, 0.0) - x * y + jnp.log1p(jnp.exp(-jnp.abs(x))))
    sig = jax.nn.sigmoid(x)
    num = 2.0 * jnp.sum(sig * y)
    denom = jnp.sum(sig * sig) + jnp.sum(y * y) + 1e-06
    return bce + (1.0 - num / denom)


def _ref_forward(preds, target):
    total = jnp.float32(0.0)
    for w, pred in zip(_WEIGHTS, preds):
        tgt = _nearest_downsample_nchw(target, pred.shape[2:])
        total = total + w * _dice_ce_ref(pred, tgt)
    return total


# ---------------------------------- main --------------------------------------

if __name__ == "__main__":
    key = jax.random.PRNGKey(0)
    k_t, k0, k1, k2, k3 = jax.random.split(key, 5)

    B, C, H, W = 2, 1, 16, 16
    # Binary segmentation target, NCHW.
    target = (jax.random.uniform(k_t, (B, C, H, W)) > 0.5).astype(jnp.float32)

    # Multi-scale deep-supervision logits, NCHW.
    preds = [
        jax.random.normal(k0, (B, C, 16, 16), jnp.float32),
        jax.random.normal(k1, (B, C, 8, 8), jnp.float32),
        jax.random.normal(k2, (B, C, 4, 4), jnp.float32),
        jax.random.normal(k3, (B, C, 2, 2), jnp.float32),
    ]

    fwd = jax.jit(multi_scale_deep_supervision)
    out = jax.block_until_ready(fwd(preds, target))

    ref = jax.block_until_ready(_ref_forward(preds, target))
    assert jnp.allclose(out, ref, atol=1e-5, rtol=1e-5), (out, ref)

    print("KERNEL_OK")
</pallas_src>

<mosaic_0001>
module attributes {stable_mosaic.version = 11 : i64} {
  func.func @_fused_dice_ce_kernel(%arg0: i32, %arg1: memref<3x4xi32, #tpu.memory_space<smem>>, %arg2: memref<8x128xf32, #tpu.memory_space<vmem>>, %arg3: memref<8x128xf32, #tpu.memory_space<vmem>>, %arg4: memref<4x4xf32, #tpu.memory_space<smem>>, %arg5: memref<4x8x128xf32, #tpu.memory_space<vmem>>) attributes {dimension_semantics = [#tpu.dimension_semantics<arbitrary>], iteration_bounds = array<i64: 4>, scalar_prefetch = 1 : i64, scratch_operands = 1 : i64, tpu.core_type = #tpu.core_type<tc>, window_params = [{transform_indices = @transform_0, window_bounds = array<i64: 8, 128>}, {transform_indices = @transform_1, window_bounds = array<i64: 8, 128>}, {transform_indices = @transform_2, window_bounds = array<i64: 4, 4>}]} {
    %c0_i32 = arith.constant 0 : i32
    %0 = arith.cmpi eq, %arg0, %c0_i32 : i32
    %1 = arith.extui %0 : i1 to i32
    %c0_i32_0 = arith.constant 0 : i32
    %2 = arith.cmpi ne, %1, %c0_i32_0 : i32
    scf.if %2 {
      %cst_24 = arith.constant 0.000000e+00 : f32
      %53 = vector.broadcast %cst_24 : f32 to vector<4x8x128xf32>
      %c0_25 = arith.constant 0 : index
      %c0_26 = arith.constant 0 : index
      %c0_27 = arith.constant 0 : index
      %54 = vector.load %arg5[%c0_25, %c0_26, %c0_27] : memref<4x8x128xf32, #tpu.memory_space<vmem>>, vector<4x8x128xf32>
      tpu.vector_store %arg5[%c0_25, %c0_26, %c0_27], %53 {strides = array<i32>} : memref<4x8x128xf32, #tpu.memory_space<vmem>>, vector<4x8x128xf32>,
    } else {
    }
    %c0 = arith.constant 0 : index
    %c0_1 = arith.constant 0 : index
    %3 = vector.load %arg2[%c0, %c0_1] : memref<8x128xf32, #tpu.memory_space<vmem>>, vector<8x128xf32>
    %c0_2 = arith.constant 0 : index
    %c0_3 = arith.constant 0 : index
    %4 = vector.load %arg3[%c0_2, %c0_3] : memref<8x128xf32, #tpu.memory_space<vmem>>, vector<8x128xf32>
    %5 = arith.negf %3 : vector<8x128xf32>
    %6 = math.exp %5 : vector<8x128xf32>
    %cst = arith.constant 1.000000e+00 : f32
    %7 = vector.broadcast %cst : f32 to vector<8x128xf32>
    %8 = arith.addf %7, %6 : vector<8x128xf32>
    %9 = arith.divf %7, %8 : vector<8x128xf32>
    %cst_4 = arith.constant 0.000000e+00 : f32
    %10 = vector.broadcast %cst_4 : f32 to vector<8x128xf32>
    %11 = arith.cmpf oge, %3, %10 : vector<8x128xf32>
    %cst_5 = arith.constant 1.000000e+00 : f32
    %12 = vector.broadcast %cst_5 : f32 to vector<8x128xf32>
    %13 = arith.subf %12, %9 : vector<8x128xf32>
    %14 = arith.select %11, %9, %13 : vector<8x128xi1>, vector<8x128xf32>
    %cst_6 = arith.constant 0.000000e+00 : f32
    %15 = vector.broadcast %cst_6 : f32 to vector<8x128xf32>
    %16 = arith.maximumf %3, %15 : vector<8x128xf32>
    %17 = arith.mulf %3, %4 : vector<8x128xf32>
    %18 = arith.subf %16, %17 : vector<8x128xf32>
    %19 = math.log %14 : vector<8x128xf32>
    %20 = arith.subf %18, %19 : vector<8x128xf32>
    %21 = arith.mulf %9, %9 : vector<8x128xf32>
    %c1 = arith.constant 1 : index
    %c0_7 = arith.constant 0 : index
    %c0_8 = arith.constant 0 : index
    %22 = vector.load %arg5[%c1, %c0_7, %c0_8] : memref<4x8x128xf32, #tpu.memory_space<vmem>>, vector<1x8x128xf32>
    %23 = vector.shape_cast %22 : vector<1x8x128xf32> to vector<8x128xf32>
    %24 = arith.mulf %9, %4 : vector<8x128xf32>
    %25 = vector.shape_cast %24 : vector<8x128xf32> to vector<1x8x128xf32>
    %cst_9 = arith.constant dense<0.000000e+00> : vector<8x128xf32>
    %26 = vector.multi_reduction <add>, %25, %cst_9 [0] : vector<1x8x128xf32> to vector<8x128xf32>
    %27 = arith.addf %23, %26 : vector<8x128xf32>
    %c1_10 = arith.constant 1 : index
    %c0_11 = arith.constant 0 : index
    %c0_12 = arith.constant 0 : index
    %28 = vector.load %arg5[%c1_10, %c0_11, %c0_12] : memref<4x8x128xf32, #tpu.memory_space<vmem>>, vector<1x8x128xf32>
    %29 = vector.shape_cast %28 : vector<1x8x128xf32> to vector<8x128xf32>
    %30 = vector.shape_cast %27 : vector<8x128xf32> to vector<1x8x128xf32>
    tpu.vector_store %arg5[%c1_10, %c0_11, %c0_12], %30 {strides = array<i32>} : memref<4x8x128xf32, #tpu.memory_space<vmem>>, vector<1x8x128xf32>,
    %c3 = arith.constant 3 : index
    %c0_13 = arith.constant 0 : index
    %c0_14 = arith.constant 0 : index
    %31 = vector.load %arg5[%c3, %c0_13, %c0_14] : memref<4x8x128xf32, #tpu.memory_space<vmem>>, vector<1x8x128xf32>
    %32 = vector.shape_cast %31 : vector<1x8x128xf32> to vector<8x128xf32>
    %33 = arith.mulf %4, %4 : vector<8x128xf32>
    %34 = vector.shape_cast %33 : vector<8x128xf32> to vector<1x8x128xf32>
    %cst_15 = arith.constant dense<0.000000e+00> : vector<8x128xf32>
    %35 = vector.multi_reduction <add>, %34, %cst_15 [0] : vector<1x8x128xf32> to vector<8x128xf32>
    %36 = arith.addf %32, %35 : vector<8x128xf32>
    %c3_16 = arith.constant 3 : index
    %c0_17 = arith.constant 0 : index
    %c0_18 = arith.constant 0 : index
    %37 = vector.load %arg5[%c3_16, %c0_17, %c0_18] : memref<4x8x128xf32, #tpu.memory_space<vmem>>, vector<1x8x128xf32>
    %38 = vector.shape_cast %37 : vector<1x8x128xf32> to vector<8x128xf32>
    %39 = vector.shape_cast %36 : vector<8x128xf32> to vector<1x8x128xf32>
    tpu.vector_store %arg5[%c3_16, %c0_17, %c0_18], %39 {strides = array<i32>} : memref<4x8x128xf32, #tpu.memory_space<vmem>>, vector<1x8x128xf32>,
    %c2 = arith.constant 2 : index
    %40 = arith.index_cast %arg0 : i32 to index
    %41 = memref.load %arg1[%c2, %40] : memref<3x4xi32, #tpu.memory_space<smem>>
    %c1024_i32 = arith.constant 1024 : i32
    %42 = arith.cmpi sge, %41, %c1024_i32 : i32
    %43 = arith.extui %42 : i1 to i32
    %c0_i32_19 = arith.constant 0 : i32
    %44 = arith.cmpi ne, %43, %c0_i32_19 : i32
    scf.if %44 {
      %c0_24 = arith.constant 0 : index
      %c0_25 = arith.constant 0 : index
      %c0_26 = arith.constant 0 : index
      %53 = vector.load %arg5[%c0_24, %c0_25, %c0_26] : memref<4x8x128xf32, #tpu.memory_space<vmem>>, vector<1x8x128xf32>
      %54 = vector.shape_cast %53 : vector<1x8x128xf32> to vector<8x128xf32>
      %55 = vector.shape_cast %20 : vector<8x128xf32> to vector<1x8x128xf32>
      %cst_27 = arith.constant dense<0.000000e+00> : vector<8x128xf32>
      %56 = vector.multi_reduction <add>, %55, %cst_27 [0] : vector<1x8x128xf32> to vector<8x128xf32>
      %57 = arith.addf %54, %56 : vector<8x128xf32>
      %c0_28 = arith.constant 0 : index
      %c0_29 = arith.constant 0 : index
      %c0_30 = arith.constant 0 : index
      %58 = vector.load %arg5[%c0_28, %c0_29, %c0_30] : memref<4x8x128xf32, #tpu.memory_space<vmem>>, vector<1x8x128xf32>
      %59 = vector.shape_cast %58 : vector<1x8x128xf32> to vector<8x128xf32>
      %60 = vector.shape_cast %57 : vector<8x128xf32> to vector<1x8x128xf32>
      tpu.vector_store %arg5[%c0_28, %c0_29, %c0_30], %60 {strides = array<i32>} : memref<4x8x128xf32, #tpu.memory_space<vmem>>, vector<1x8x128xf32>,
      %c2_31 = arith.constant 2 : index
      %c0_32 = arith.constant 0 : index
      %c0_33 = arith.constant 0 : index
      %61 = vector.load %arg5[%c2_31, %c0_32, %c0_33] : memref<4x8x128xf32, #tpu.memory_space<vmem>>, vector<1x8x128xf32>
      %62 = vector.shape_cast %61 : vector<1x8x128xf32> to vector<8x128xf32>
      %63 = vector.shape_cast %21 : vector<8x128xf32> to vector<1x8x128xf32>
      %cst_34 = arith.constant dense<0.000000e+00> : vector<8x128xf32>
      %64 = vector.multi_reduction <add>, %63, %cst_34 [0] : vector<1x8x128xf32> to vector<8x128xf32>
      %65 = arith.addf %62, %64 : vector<8x128xf32>
      %c2_35 = arith.constant 2 : index
      %c0_36 = arith.constant 0 : index
      %c0_37 = arith.constant 0 : index
      %66 = vector.load %arg5[%c2_35, %c0_36, %c0_37] : memref<4x8x128xf32, #tpu.memory_space<vmem>>, vector<1x8x128xf32>
      %67 = vector.shape_cast %66 : vector<1x8x128xf32> to vector<8x128xf32>
      %68 = vector.shape_cast %65 : vector<8x128xf32> to vector<1x8x128xf32>
      tpu.vector_store %arg5[%c2_35, %c0_36, %c0_37], %68 {strides = array<i32>} : memref<4x8x128xf32, #tpu.memory_space<vmem>>, vector<1x8x128xf32>,
    } else {
    }
    %c1024_i32_20 = arith.constant 1024 : i32
    %45 = arith.cmpi slt, %41, %c1024_i32_20 : i32
    %46 = arith.extui %45 : i1 to i32
    %c0_i32_21 = arith.constant 0 : i32
    %47 = arith.cmpi ne, %46, %c0_i32_21 : i32
    scf.if %47 {
      %53 = tpu.iota {dimensions = array<i32: 0>} : vector<8x128xi32>
      %54 = tpu.iota {dimensions = array<i32: 1>} : vector<8x128xi32>
      %c128_i32 = arith.constant 128 : i32
      %55 = vector.broadcast %c128_i32 : i32 to vector<8x128xi32>
      %56 = arith.muli %53, %55 : vector<8x128xi32>
      %57 = arith.addi %56, %54 : vector<8x128xi32>
      %58 = vector.broadcast %41 : i32 to vector<8x128xi32>
      %59 = arith.cmpi slt, %57, %58 : vector<8x128xi32>
      %60 = arith.extui %59 : vector<8x128xi1> to vector<8x128xi32>
      %61 = arith.sitofp %60 : vector<8x128xi32> to vector<8x128xf32>
      %c0_24 = arith.constant 0 : index
      %c0_25 = arith.constant 0 : index
      %c0_26 = arith.constant 0 : index
      %62 = vector.load %arg5[%c0_24, %c0_25, %c0_26] : memref<4x8x128xf32, #tpu.memory_space<vmem>>, vector<1x8x128xf32>
      %63 = vector.shape_cast %62 : vector<1x8x128xf32> to vector<8x128xf32>
      %64 = arith.mulf %20, %61 : vector<8x128xf32>
      %65 = vector.shape_cast %64 : vector<8x128xf32> to vector<1x8x128xf32>
      %cst_27 = arith.constant dense<0.000000e+00> : vector<8x128xf32>
      %66 = vector.multi_reduction <add>, %65, %cst_27 [0] : vector<1x8x128xf32> to vector<8x128xf32>
      %67 = arith.addf %63, %66 : vector<8x128xf32>
      %c0_28 = arith.constant 0 : index
      %c0_29 = arith.constant 0 : index
      %c0_30 = arith.constant 0 : index
      %68 = vector.load %arg5[%c0_28, %c0_29, %c0_30] : memref<4x8x128xf32, #tpu.memory_space<vmem>>, vector<1x8x128xf32>
      %69 = vector.shape_cast %68 : vector<1x8x128xf32> to vector<8x128xf32>
      %70 = vector.shape_cast %67 : vector<8x128xf32> to vector<1x8x128xf32>
      tpu.vector_store %arg5[%c0_28, %c0_29, %c0_30], %70 {strides = array<i32>} : memref<4x8x128xf32, #tpu.memory_space<vmem>>, vector<1x8x128xf32>,
      %c2_31 = arith.constant 2 : index
      %c0_32 = arith.constant 0 : index
      %c0_33 = arith.constant 0 : index
      %71 = vector.load %arg5[%c2_31, %c0_32, %c0_33] : memref<4x8x128xf32, #tpu.memory_space<vmem>>, vector<1x8x128xf32>
      %72 = vector.shape_cast %71 : vector<1x8x128xf32> to vector<8x128xf32>
      %73 = arith.mulf %21, %61 : vector<8x128xf32>
      %74 = vector.shape_cast %73 : vector<8x128xf32> to vector<1x8x128xf32>
      %cst_34 = arith.constant dense<0.000000e+00> : vector<8x128xf32>
      %75 = vector.multi_reduction <add>, %74, %cst_34 [0] : vector<1x8x128xf32> to vector<8x128xf32>
      %76 = arith.addf %72, %75 : vector<8x128xf32>
      %c2_35 = arith.constant 2 : index
      %c0_36 = arith.constant 0 : index
      %c0_37 = arith.constant 0 : index
      %77 = vector.load %arg5[%c2_35, %c0_36, %c0_37] : memref<4x8x128xf32, #tpu.memory_space<vmem>>, vector<1x8x128xf32>
      %78 = vector.shape_cast %77 : vector<1x8x128xf32> to vector<8x128xf32>
      %79 = vector.shape_cast %76 : vector<8x128xf32> to vector<1x8x128xf32>
      tpu.vector_store %arg5[%c2_35, %c0_36, %c0_37], %79 {strides = array<i32>} : memref<4x8x128xf32, #tpu.memory_space<vmem>>, vector<1x8x128xf32>,
    } else {
    }
    %c1_22 = arith.constant 1 : index
    %48 = arith.index_cast %arg0 : i32 to index
    %49 = memref.load %arg1[%c1_22, %48] : memref<3x4xi32, #tpu.memory_space<smem>>
    %c1_i32 = arith.constant 1 : i32
    %50 = arith.cmpi eq, %49, %c1_i32 : i32
    %51 = arith.extui %50 : i1 to i32
    %c0_i32_23 = arith.constant 0 : i32
    %52 = arith.cmpi ne, %51, %c0_i32_23 : i32
    scf.if %52 {
      %c0_24 = arith.constant 0 : index
      %53 = arith.index_cast %arg0 : i32 to index
      %54 = memref.load %arg1[%c0_24, %53] : memref<3x4xi32, #tpu.memory_space<smem>>
      %c0_25 = arith.constant 0 : index
      %c0_26 = arith.constant 0 : index
      %c0_27 = arith.constant 0 : index
      %55 = vector.load %arg5[%c0_25, %c0_26, %c0_27] : memref<4x8x128xf32, #tpu.memory_space<vmem>>, vector<1x8x128xf32>
      %56 = vector.shape_cast %55 : vector<1x8x128xf32> to vector<8x128xf32>
      %57 = vector.shape_cast %56 : vector<8x128xf32> to vector<1x8x128xf32>
      %cst_28 = arith.constant dense<0.000000e+00> : vector<1xf32>
      %58 = vector.multi_reduction <add>, %57, %cst_28 [1, 2] : vector<1x8x128xf32> to vector<1xf32>
      %59 = vector.shape_cast %58 : vector<1xf32> to vector<1x1x1xf32>
      %60 = vector.extract %59[0, 0, 0] : f32 from vector<1x1x1xf32>
      %61 = arith.index_cast %54 : i32 to index
      %c0_29 = arith.constant 0 : index
      %62 = memref.load %arg4[%61, %c0_29] : memref<4x4xf32, #tpu.memory_space<smem>>
      memref.store %60, %arg4[%61, %c0_29] : memref<4x4xf32, #tpu.memory_space<smem>>
      %c1_30 = arith.constant 1 : index
      %c0_31 = arith.constant 0 : index
      %c0_32 = arith.constant 0 : index
      %63 = vector.load %arg5[%c1_30, %c0_31, %c0_32] : memref<4x8x128xf32, #tpu.memory_space<vmem>>, vector<1x8x128xf32>
      %64 = vector.shape_cast %63 : vector<1x8x128xf32> to vector<8x128xf32>
      %65 = vector.shape_cast %64 : vector<8x128xf32> to vector<1x8x128xf32>
      %cst_33 = arith.constant dense<0.000000e+00> : vector<1xf32>
      %66 = vector.multi_reduction <add>, %65, %cst_33 [1, 2] : vector<1x8x128xf32> to vector<1xf32>
      %67 = vector.shape_cast %66 : vector<1xf32> to vector<1x1x1xf32>
      %68 = vector.extract %67[0, 0, 0] : f32 from vector<1x1x1xf32>
      %69 = arith.index_cast %54 : i32 to index
      %c1_34 = arith.constant 1 : index
      %70 = memref.load %arg4[%69, %c1_34] : memref<4x4xf32, #tpu.memory_space<smem>>
      memref.store %68, %arg4[%69, %c1_34] : memref<4x4xf32, #tpu.memory_space<smem>>
      %c2_35 = arith.constant 2 : index
      %c0_36 = arith.constant 0 : index
      %c0_37 = arith.constant 0 : index
      %71 = vector.load %arg5[%c2_35, %c0_36, %c0_37] : memref<4x8x128xf32, #tpu.memory_space<vmem>>, vector<1x8x128xf32>
      %72 = vector.shape_cast %71 : vector<1x8x128xf32> to vector<8x128xf32>
      %73 = vector.shape_cast %72 : vector<8x128xf32> to vector<1x8x128xf32>
      %cst_38 = arith.constant dense<0.000000e+00> : vector<1xf32>
      %74 = vector.multi_reduction <add>, %73, %cst_38 [1, 2] : vector<1x8x128xf32> to vector<1xf32>
      %75 = vector.shape_cast %74 : vector<1xf32> to vector<1x1x1xf32>
      %76 = vector.extract %75[0, 0, 0] : f32 from vector<1x1x1xf32>
      %77 = arith.index_cast %54 : i32 to index
      %c2_39 = arith.constant 2 : index
      %78 = memref.load %arg4[%77, %c2_39] : memref<4x4xf32, #tpu.memory_space<smem>>
      memref.store %76, %arg4[%77, %c2_39] : memref<4x4xf32, #tpu.memory_space<smem>>
      %c3_40 = arith.constant 3 : index
      %c0_41 = arith.constant 0 : index
      %c0_42 = arith.constant 0 : index
      %79 = vector.load %arg5[%c3_40, %c0_41, %c0_42] : memref<4x8x128xf32, #tpu.memory_space<vmem>>, vector<1x8x128xf32>
      %80 = vector.shape_cast %79 : vector<1x8x128xf32> to vector<8x128xf32>
      %81 = vector.shape_cast %80 : vector<8x128xf32> to vector<1x8x128xf32>
      %cst_43 = arith.constant dense<0.000000e+00> : vector<1xf32>
      %82 = vector.multi_reduction <add>, %81, %cst_43 [1, 2] : vector<1x8x128xf32> to vector<1xf32>
      %83 = vector.shape_cast %82 : vector<1xf32> to vector<1x1x1xf32>
      %84 = vector.extract %83[0, 0, 0] : f32 from vector<1x1x1xf32>
      %85 = arith.index_cast %54 : i32 to index
      %c3_44 = arith.constant 3 : index
      %86 = memref.load %arg4[%85, %c3_44] : memref<4x4xf32, #tpu.memory_space<smem>>
      memref.store %84, %arg4[%85, %c3_44] : memref<4x4xf32, #tpu.memory_space<smem>>
      %cst_45 = arith.constant 0.000000e+00 : f32
      %87 = vector.broadcast %cst_45 : f32 to vector<4x8x128xf32>
      %c0_46 = arith.constant 0 : index
      %c0_47 = arith.constant 0 : index
      %c0_48 = arith.constant 0 : index
      %88 = vector.load %arg5[%c0_46, %c0_47, %c0_48] : memref<4x8x128xf32, #tpu.memory_space<vmem>>, vector<4x8x128xf32>
      tpu.vector_store %arg5[%c0_46, %c0_47, %c0_48], %87 {strides = array<i32>} : memref<4x8x128xf32, #tpu.memory_space<vmem>>, vector<4x8x128xf32>,
    } else {
    }
    return
  }
  func.func @transform_0(%arg0: i32, %arg1: memref<3x4xi32, #tpu.memory_space<smem>>) -> (i32, i32) {
    %c0_i32 = arith.constant 0 : i32
    %c0_i32_0 = arith.constant 0 : i32
    return %arg0, %c0_i32 : i32, i32
  }
  func.func @transform_1(%arg0: i32, %arg1: memref<3x4xi32, #tpu.memory_space<smem>>) -> (i32, i32) {
    %c0_i32 = arith.constant 0 : i32
    %c0_i32_0 = arith.constant 0 : i32
    return %arg0, %c0_i32 : i32, i32
  }
  func.func @transform_2(%arg0: i32, %arg1: memref<3x4xi32, #tpu.memory_space<smem>>) -> (i32, i32) {
    %c0_i32 = arith.constant 0 : i32
    %c0_i32_0 = arith.constant 0 : i32
    %c0_i32_1 = arith.constant 0 : i32
    return %c0_i32, %c0_i32_0 : i32, i32
  }
}

</mosaic_0001>

<bundles_post_ra>
// kernel: multi_scale_deep_supervision.1
= control target key start
LH: loop header
LB: loop body
LE: loop exit
PB: predicated region body
PF: predicated region fallthrough
CT: control target
= control target key end

     0   :  { %s548_s0 = inlined_call_operand.vmem [shape: s32[3,4], index: 0, kind: input, shape index: {}]   ;;  %s549_s1 = inlined_call_operand.vmem [shape: f32[32,128], index: 1, kind: input, shape index: {}]   ;;  %s550_s2 = inlined_call_operand.vmem [shape: f32[32,128], index: 2, kind: input, shape index: {}]   ;;  %s551_s3 = inlined_call_operand.vmem [shape: f32[4,4], index: 3, kind: output, shape index: {}]  }
   0x1   :  { %s8_s14 = sshll.u32 %s548_s0, 4  ;;  %s9_s14 = int_to_ptr.vmem [resolvable:$true] %s8_s14 }
   0x2   :  { %s430_s15 = scalar_lea.vmem %s9_s14, 64  ;;  %p435_p1 = scmp.lt.s32.totalorder %s9_s14, %s9_s14 }
   0x3   :  { %p431_p0 = scmp.ne.s32.totalorder %s9_s14, %s430_s15  ;;  %p436_p2 = scmp.lt.s32.totalorder %s430_s15, %s430_s15 }
   0x5   :  { %p437_p3 = por %p436_p2, %p435_p1 }
   0x7   :  { %p438_p4 = pnand %p437_p3, %p431_p0 }
   0x9   :  { %441 = shalt.err (!%p438_p4)  }
   0xa   :  { %s470_s16 = smov [#allocation4]  }
   0xb   :  { %11 = dma.vmem_to_smem %s9_s14, 64, %s470_s16, [#allocation3] }
   0xc   :  { %460 = dma.done.wait [#allocation3], 64 }
   0xd   :  { %461 = vsyncadd [#allocation3], 4294967232 }
   0xe   :  { %13 = sfence }
   0xf   :  { %14 = vsyncpa [#allocation6], 0  ;;  %s498_s17 = smov 0  }
  0x10 LB: > { %s504_s0 = sadd.s32 4294967295, %s468_s17   ;;  %p374_p5 = scmp.ge.s32.totalorder %s468_s17, 1  ;;  %s468_s17 = sphi %s498_s17, %s20_s17  }
  0x11   : > { %p123_p6 = scmp.lt.s32.totalorder %s468_s17, 5 }
  0x13   : > { %p124_p7 = pnand %p374_p5, %p123_p6 }
  0x14   : > { %p143_p8 = scmp.lt.s32.totalorder (!%p124_p7), %s504_s0, 3  ;;  %p377_p9 = scmp.ne.s32.totalorder (!%p124_p7), %s504_s0, 0 }
  0x15   : > { %127 = sbr.rel (%p124_p7) target bundleno = 337 (0x151), region = 28 }
  0x1c   : > { %s144_s18 = scalar_select %p143_p8, %s504_s0, 3 }
  0x1d   : > { %154 = sbr.rel (%p377_p9) target bundleno = 36 (0x24), region = 32  ;;  %v471_v0 = vmov (!%p377_p9), 0.0  }
  0x1e   : > { %s375_s19 = sshll.u32 %s144_s18, 3  ;;  %155 = vst [vmem:[#allocation2] sm:$0xff] (!%p377_p9), %v471_v0  ;;  %156 = vst [vmem:[#allocation2 + $0x8] sm:$0xff] (!%p377_p9), %v471_v0 }
  0x1f   : > { %s146_s22 = scalar_lea.vmem %s549_s1, %s375_s19  ;;  %s150_s25 = scalar_lea.vmem %s550_s2, %s375_s19  ;;  %157 = vst [vmem:[#allocation2 + $0x10] sm:$0xff] (!%p377_p9), %v471_v0  ;;  %158 = vst [vmem:[#allocation2 + $0x18] sm:$0xff] (!%p377_p9), %v471_v0 }
  0x24 PF: > { %v159_v1 = vld [vmem:[%s146_s22] sm:$0xff]  ;;  %s189_s26 = sshra.s32 %s504_s0, 7  ;;  %s194_s27 = sand.u32 127, %s504_s0 }
  0x25   : > { %v160_v2 = vld [vmem:[%s150_s25] sm:$0xff]  ;;  %v378_v3 = vmul.f32 -1.442695, %v159_v1  ;;  %s519_s28 = sshll.u32 %s189_s26, 7  ;;  %vm167_vm0 = vcmp.ge.f32.partialorder %v159_v1, 0.0  ;;  %v178_v10 = vld [vmem:[#allocation2 + $0x8] sm:$0xff] }
  0x26   : > { %v184_v4 = vld [vmem:[#allocation2 + $0x18] sm:$0xff]  ;;  %v185_v5 = vmul.f32 %v160_v2, %v160_v2  ;;  %s394_s29 = sadd.s32 256, %s519_s28  ;;  %v170_v16 = vmax.f32 %v159_v1, 0.0  ;;  %v171_v17 = vmul.f32 %v160_v2, %v159_v1 }
  0x27   : > { %424 = vpow2.f32 %v378_v3  ;;  %s195_s30 = sadd.s32 %s394_s29, %s194_s27 }
  0x28   : > { %v187_v6 = vadd.f32 %v185_v5, %v184_v4  ;;  %s524_s4 = sld [smem:[#allocation4 + %s195_s30]]  ;;  %v172_v18 = vsub.f32 %v170_v16, %v171_v17 }
  0x2a   : > { %188 = vst [vmem:[#allocation2 + $0x18] sm:$0xff] %v187_v6 }
  0x2e   : > { %p380_p10 = scmp.lt.s32.totalorder %s524_s4, 1024 }
  0x2f   : > { %v201_v22 = vld [vmem:[#allocation2] sm:$0xff] (!%p380_p10)  ;;  %v206_v23 = vld [vmem:[#allocation2 + $0x10] sm:$0xff] (!%p380_p10) }
  0x31   : > { %v425_v7 = vpop.eup %424 }
  0x32   : > { %v164_v8 = vadd.f32 1.0, %v425_v7 }
  0x34   : > { %426 = vrcp.f32 %v164_v8 }
  0x3e   : > { %v427_v9 = vpop.eup %426 }
  0x3f   : > { %v168_v11 = vsub.f32 1.0, %v427_v9  ;;  %v176_v12 = vmul.f32 %v427_v9, %v427_v9  ;;  %v179_v13 = vmul.f32 %v427_v9, %v160_v2 }
  0x41   : > { %v169_v14 = vsel %vm167_vm0, %v427_v9, %v168_v11  ;;  %v181_v15 = vadd.f32 %v179_v13, %v178_v10  ;;  %v208_v25 = vadd.f32 (!%p380_p10), %v206_v23, %v176_v12 }
  0x42   : > { %428 = vlog2.f32 %v169_v14 }
  0x43   : > { %182 = vst [vmem:[#allocation2 + $0x8] sm:$0xff] %v181_v15  ;;  %209 = vst [vmem:[#allocation2 + $0x10] sm:$0xff] (!%p380_p10), %v208_v25 }
  0x49   : > { %200 = sbr.rel (%p380_p10) target bundleno = 84 (0x54), region = 36 }
  0x4c   : > { %v429_v19 = vpop.eup %428 }
  0x4d   : > { %v174_v20 = vmul.f32 0.6931472, %v429_v19 }
  0x4f   : > { %v175_v21 = vsub.f32 %v172_v18, %v174_v20 }
  0x51   : > { %v203_v24 = vadd.f32 %v201_v22, %v175_v21 }
  0x53   : > { %204 = vst [vmem:[#allocation2] sm:$0xff] %v203_v24 }
  0x54 PF: > { %p381_p11 = scmp.ge.s32.totalorder %s524_s4, 1024 }
  0x55   : > { %v214_v26 = vlaneseq (!%p381_p11)  ;;  %v220_v30 = vstv (!%p381_p11), %s524_s4  ;;  %v472_v32 = vmov (!%p381_p11), 0.0   ;;  %v230_v35 = vld [vmem:[#allocation2 + $0x10] sm:$0xff] (!%p381_p11) }
  0x56   : > { %213 = sbr.rel (%p381_p11) target bundleno = 100 (0x64), region = 40 }
  0x57   : > { %v215_v27 = vshrl.u32 (!%p381_p11), %v214_v26, 7  ;;  %v217_v28 = vand.u32 (!%p381_p11), 127, %v214_v26 }
  0x59   : > { %v218_v29 = vmul.u32 (!%p381_p11), 128, %v215_v27 }
  0x5a   : > { %v224_v34 = vld [vmem:[#allocation2] sm:$0xff] (!%p381_p11) }
  0x5b   : > { %v219_v31 = vadd.s32 (!%p381_p11), %v218_v29, %v217_v28 }
  0x5d   : > { %vm221_vm1 = vcmp.lt.s32.totalorder %v219_v31, %v220_v30 }
  0x5e   : > { %v382_v33 = vsel %vm221_vm1, 1.0, %v472_v32 }
  0x5f   : > { %v225_v36 = vmul.f32 %v382_v33, %v175_v21  ;;  %v231_v37 = vmul.f32 %v382_v33, %v176_v12 }
  0x61   : > { %v227_v38 = vadd.f32 %v225_v36, %v224_v34  ;;  %v233_v39 = vadd.f32 %v231_v37, %v230_v35 }
  0x63   : > { %228 = vst [vmem:[#allocation2] sm:$0xff] %v227_v38  ;;  %234 = vst [vmem:[#allocation2 + $0x10] sm:$0xff] %v233_v39 }
  0x64 PF: > { %s396_s5 = sadd.s32 128, %s519_s28 }
  0x65   : > { %s237_s6 = sadd.s32 %s396_s5, %s194_s27 }
  0x66   : > { %s238_s7 = sld [smem:[#allocation4 + %s237_s6]] }
  0x6c   : > { %p384_p12 = scmp.ne.s32.totalorder %s238_s7, 1 }
  0x6d   : > { %v271_v40 = vld [vmem:[#allocation2 + $0x10] sm:$0xff] (!%p384_p12)  ;;  %v244_v41 = vld [vmem:[#allocation2] sm:$0xff] (!%p384_p12)  ;;  %v284_v42 = vld [vmem:[#allocation2 + $0x18] sm:$0xff] (!%p384_p12)  ;;  %v473_v43 = vmov (!%p384_p12), 0.0   ;;  %s243_s8 = sld [smem:[#allocation4 + %s504_s0]] (!%p384_p12) }
  0x6e   : > { %242 = sbr.rel (%p384_p12) target bundleno = 321 (0x141), region = 44  ;;  %272 = vadd.xlane.f32.xlu1 (!%p384_p12), %v271_v40  ;;  %299 = vst [vmem:[#allocation2 + $0x10] sm:$0xff] (!%p384_p12), %v473_v43  ;;  %245 = vadd.xlane.f32.xlu0 (!%p384_p12), %v244_v41  ;;  %297 = vst [vmem:[#allocation2] sm:$0xff] (!%p384_p12), %v473_v43  ;;  %v257_v44 = vld [vmem:[#allocation2 + $0x8] sm:$0xff] (!%p384_p12) }
  0x6f   : > { %300 = vst [vmem:[#allocation2 + $0x18] sm:$0xff] (!%p384_p12), %v473_v43  ;;  %298 = vst [vmem:[#allocation2 + $0x8] sm:$0xff] (!%p384_p12), %v473_v43 }
  0x72   : > { %285 = vadd.xlane.f32.xlu1 (!%p384_p12), %v284_v42  ;;  %258 = vadd.xlane.f32.xlu0 (!%p384_p12), %v257_v44 }
  0x73   : > { %s385_s9 = sshll.u32 (!%p384_p12), %s243_s8, 7 }
  0x74   : > { %s255_s11 = scalar_lea.smem (!%p384_p12), [#allocation5], %s385_s9 }
  0x75   : > { %s341_s12 = scalar_lea.smem %s255_s11, 1 [#allocation5]  ;;  %s344_s13 = scalar_lea.smem %s255_s11, 2 [#allocation5] }
  0x76   : > { %s347_s15 = scalar_lea.smem %s255_s11, 3 [#allocation5] }
  0xfb   : > { %v273_v45 = vpop.xlane.xlu1 %272  ;;  %v246_v46 = vpop.xlane.xlu0 %245 }
  0xfc   : > { %v274_v47 = vrot.slane %v273_v45, 4  ;;  %v247_v48 = vrot.slane %v246_v46, 4 }
  0xfe   : > { %v275_v49 = vadd.f32 %v274_v47, %v273_v45  ;;  %v248_v50 = vadd.f32 %v247_v48, %v246_v46 }
  0xff   : > { %v286_v51 = vpop.xlane.xlu1 %285  ;;  %v259_v52 = vpop.xlane.xlu0 %258 }
 0x100   : > { %v276_v53 = vrot.slane %v275_v49, 2  ;;  %v249_v54 = vrot.slane %v248_v50, 2  ;;  %v287_v55 = vrot.slane %v286_v51, 4  ;;  %v260_v56 = vrot.slane %v259_v52, 4 }
 0x102   : > { %v288_v57 = vadd.f32 %v287_v55, %v286_v51  ;;  %v261_v58 = vadd.f32 %v260_v56, %v259_v52  ;;  %v250_v59 = vadd.f32 %v249_v54, %v248_v50  ;;  %v277_v60 = vadd.f32 %v276_v53, %v275_v49 }
 0x104   : > { %v289_v61 = vrot.slane %v288_v57, 2  ;;  %v262_v62 = vrot.slane %v261_v58, 2  ;;  %v251_v63 = vrot.slane %v250_v59, 1  ;;  %v278_v3 = vrot.slane %v277_v60, 1 }
 0x106   : > { %v290_v0 = vadd.f32 %v289_v61, %v288_v57  ;;  %v263_v1 = vadd.f32 %v262_v62, %v261_v58  ;;  %v252_v2 = vadd.f32 %v251_v63, %v250_v59  ;;  %v279_v8 = vadd.f32 %v278_v3, %v277_v60 }
 0x108   : > { %397 = vpush %v252_v2  ;;  %v264_v4 = vrot.slane %v263_v1, 1  ;;  %v291_v5 = vrot.slane %v290_v0, 1 }
 0x10a   : > { %v265_v6 = vadd.f32 %v264_v4, %v263_v1  ;;  %v292_v7 = vadd.f32 %v291_v5, %v290_v0 }
 0x10c   : > { %399 = vpush %v265_v6 }
 0x10d   : > { %401 = vpush %v279_v8 }
 0x10e   : > { %403 = vpush %v292_v7 }
 0x139   : > { %s398_s10 = spop %397 }
 0x13a   : > { %256 = sst [smem:[%s255_s11]] %s398_s10 }
 0x13d   : > { %s400_s14 = spop %399 }
 0x13e   : > { %269 = sst [smem:[%s341_s12]] %s400_s14  ;;  %s402_s16 = spop %401 }
 0x13f   : > { %283 = sst [smem:[%s344_s13]] %s402_s16  ;;  %s404_s18 = spop %403 }
 0x140   : > { %296 = sst [smem:[%s347_s15]] %s404_s18 }
 0x141 PF: > { %p409_p13 = scmp.eq.s32.totalorder %s504_s0, 3  ;;  %s308_s21 = sshll.u32 %s551_s3, 4  ;;  %s309_s21 = int_to_ptr.vmem [resolvable:$true] %s308_s21 }
 0x142   : > { %s442_s22 = scalar_lea.vmem %s309_s21, 64  ;;  %p449_p3 = scmp.lt.s32.totalorder %s309_s21, %s309_s21 }
 0x143   : > { %p443_p0 = scmp.ne.s32.totalorder %s309_s21, %s442_s22  ;;  %p450_p4 = scmp.lt.s32.totalorder %s442_s22, %s442_s22 }
 0x145   : > { %p444_p1 = pnand %p443_p0, %p409_p13  ;;  %p451_p5 = por %p450_p4, %p449_p3 }
 0x147   : > { %p445_p2 = pneg %p444_p1 }
 0x149   : > { %p452_p6 = pnand %p451_p5, %p445_p2 }
 0x14b   : > { %455 = shalt.err (!%p452_p6)
}
 0x14c   : > { %s474_s23 = smov [#allocation5]  }
 0x14d   : > { %406 = dma.smem_to_vmem (%p409_p13), %s474_s23, 64, %s309_s21, [#allocation6]  }
 0x14e   : > { %463 = dma.done.wait (%p409_p13), [#allocation6], 64  }
 0x14f   : > { %465 = vsyncadd (%p409_p13), [#allocation6], 4294967232 }
 0x150   : > { %316 = sfence }
 0x151 PF: > { %s20_s17 = sadd.s32 1, %s468_s17  }
 0x152   : > { %p17_p7 = scmp.ge.s32.totalorder %s20_s17, 6  }
 0x154   :  { %19 = sbr.rel (!%p17_p7) target bundleno = 16 (0x10), region = 83 }
 0x15b   :  { %322 = vsyncpa [#allocation6], 1 }
 0x15c   :  { %324 = vsyncpa [#allocation6 + $0x1], 1 }

</bundles_post_ra>
